<compile_context>
chip_gen: v5e
topology: v5e:2x2
jax: 0.10.0
libtpu: 0.0.40
codegen_flags: <defaults>
</compile_context>

<pallas_src>
import jax
import jax.numpy as jnp
from jax import lax
from jax.experimental import pallas as pl
from jax.experimental.pallas import tpu as pltpu


def mlp_kernel(x_ref, w1_ref, b1_ref, w2_ref, b2_ref, o_ref):
    # x_ref: (tb, 10) natural-layout batch tile (VMEM, pipelined).
    # w1_ref: (5, 10), b1_ref: (5, 1), w2_ref: (5, 1), b2_ref: (1, 1) — tiny
    # resident VMEM parameters.  o_ref: (1, tb) lane-dense output row.
    x = x_ref[...]                                   # (tb, 10) f32
    w1 = w1_ref[...]                                 # (5, 10)

    # fc1 on the MXU, computed transposed so batch lands on the 128-lane axis:
    # hT[j, b] = sum_k w1[j, k] * x[b, k]            -> (5, tb)
    hT = lax.dot_general(
        w1, x, (((1,), (1,)), ((), ())),
        preferred_element_type=jnp.float32)
    hT = jnp.maximum(hT + b1_ref[...], 0.0)          # bias (5,1) bcast + ReLU (VPU)

    # fc2: dense (5, tb) multiply + sublane reduction (XLU slot), stays lane-dense.
    yT = jnp.sum(hT * w2_ref[...], axis=0, keepdims=True) + b2_ref[...]  # (1, tb)
    o_ref[...] = yT.astype(o_ref.dtype)              # unmasked lane-dense store


def llm_model_forward(x, w1, b1, w2, b2, *, block_b=16384):
    """Forward pass of LLMModel.

    x:  (B, 10) float32 — natural PyTorch layout (no host-side transpose/pad).
    w1: (5, 10) fc1.weight, b1: (5,) fc1.bias, w2: (1, 5) fc2.weight, b2: (1,) fc2.bias.
    Returns (B, 1) float32.
    """
    B, f_in = x.shape
    h = w1.shape[0]

    # Tiny parameter reshapes (O(10) elements, once at trace time).
    w1c = jnp.asarray(w1, jnp.float32).reshape(h, f_in)
    b1c = jnp.asarray(b1, jnp.float32).reshape(h, 1)
    w2c = jnp.asarray(w2, jnp.float32).reshape(h, 1)   # fc2.weight row -> column
    b2c = jnp.asarray(b2, jnp.float32).reshape(1, 1)

    # Batch tile: whole batch if it fits one block; otherwise a multiple of 128
    # (lane-dense (1, tb) output blocks), capped so the grid has >= 2 steps and
    # the "parallel" axis can feed both TensorCores on v7x.
    if B <= block_b:
        tb = B
    else:
        half = (B + 1) // 2
        tb = min(block_b, ((half + 127) // 128) * 128)
        tb = max(128, (tb // 128) * 128)
    grid = pl.cdiv(B, tb)  # ragged tail handled by clamped boundary-block DMAs

    # Double-buffered VMEM footprint: the (tb, 10) f32 input block lane-pads
    # 10 -> 128 (512 B/row); the (1, tb) output block sublane-pads 1 -> 8
    # (32 B/col).  Raise the scoped-VMEM limit explicitly only when needed.
    x_buf = ((tb + 7) // 8) * 8 * 128 * 4
    o_buf = 8 * ((tb + 127) // 128) * 128 * 4
    est_vmem = 2 * (x_buf + o_buf) + (1 << 16)
    cp_kwargs = dict(dimension_semantics=("parallel",))
    if est_vmem > 12 * 1024 * 1024:
        cp_kwargs["vmem_limit_bytes"] = min(
            max(int(est_vmem * 3 // 2), 32 * 1024 * 1024), 64 * 1024 * 1024)
    compiler_params = pltpu.CompilerParams(**cp_kwargs)

    out = pl.pallas_call(
        mlp_kernel,
        out_shape=jax.ShapeDtypeStruct((1, B), jnp.float32),
        grid=(grid,),
        in_specs=[
            # x: (tb, 10) blocks pipelined over the batch.  (Optional knob if a
            # trace ever shows exposed DMA: pipeline_mode=pl.Buffered(3).)
            pl.BlockSpec((tb, f_in), lambda i: (i, 0)),
            # Resident VMEM parameters (constant block index -> fetched once).
            pl.BlockSpec((h, f_in), lambda i: (0, 0)),
            pl.BlockSpec((h, 1), lambda i: (0, 0)),
            pl.BlockSpec((h, 1), lambda i: (0, 0)),
            pl.BlockSpec((1, 1), lambda i: (0, 0)),
        ],
        out_specs=pl.BlockSpec((1, tb), lambda i: (0, i)),  # lane-dense output row
        compiler_params=compiler_params,
    )(x, w1c, b1c, w2c, b2c)

    # (1, B) -> (B, 1): pure metadata reshape (row-major), no transpose op.
    return out.reshape(B, 1)


def init_params(key):
    # Deterministic init mimicking nn.Linear's uniform(-1/sqrt(fan_in), +...),
    # with exact PyTorch parameter layouts.
    k1, k2, k3, k4 = jax.random.split(key, 4)
    lim1 = 1.0 / (10.0 ** 0.5)
    lim2 = 1.0 / (5.0 ** 0.5)
    w1 = jax.random.uniform(k1, (5, 10), jnp.float32, -lim1, lim1)  # fc1.weight
    b1 = jax.random.uniform(k2, (5,), jnp.float32, -lim1, lim1)     # fc1.bias
    w2 = jax.random.uniform(k3, (1, 5), jnp.float32, -lim2, lim2)   # fc2.weight
    b2 = jax.random.uniform(k4, (1,), jnp.float32, -lim2, lim2)     # fc2.bias
    return w1, b1, w2, b2


# TODO(synk): train_model (MSELoss + SGD training loop) is host-side training
# logic, not part of the forward pass, and is intentionally not a kernel.

if __name__ == "__main__":
    key = jax.random.PRNGKey(0)
    kx1, kx2, kp = jax.random.split(key, 3)
    w1, b1, w2, b2 = init_params(kp)

    def ref_forward(x):
        hidden = jnp.maximum(x @ w1.T + b1, 0.0)
        return hidden @ w2.T + b2

    # Case 1: small batch -> single full-array block, grid=(1,).
    B1 = 8
    x1 = jax.random.normal(kx1, (B1, 10), jnp.float32)
    y1 = llm_model_forward(x1, w1, b1, w2, b2)
    jax.block_until_ready(y1)
    assert y1.shape == (B1, 1)
    assert jnp.allclose(y1, ref_forward(x1), atol=1e-5, rtol=1e-5)

    # Case 2: batch tiled over a "parallel" grid with a ragged tail
    # (200 = 128 + 72) handled by clamped boundary DMAs — no host-side padding.
    B2 = 200
    x2 = jax.random.normal(kx2, (B2, 10), jnp.float32)
    y2 = llm_model_forward(x2, w1, b1, w2, b2, block_b=128)
    jax.block_until_ready(y2)
    assert y2.shape == (B2, 1)
    assert jnp.allclose(y2, ref_forward(x2), atol=1e-5, rtol=1e-5)

    print("KERNEL_OK")
</pallas_src>

<mosaic_0001>
module attributes {stable_mosaic.version = 11 : i64} {
  func.func @mlp_kernel(%arg0: i32, %arg1: memref<8x10xf32, #tpu.memory_space<vmem>>, %arg2: memref<5x10xf32, #tpu.memory_space<vmem>>, %arg3: memref<5x1xf32, #tpu.memory_space<vmem>>, %arg4: memref<5x1xf32, #tpu.memory_space<vmem>>, %arg5: memref<1x1xf32, #tpu.memory_space<vmem>>, %arg6: memref<1x8xf32, #tpu.memory_space<vmem>>) attributes {dimension_semantics = [#tpu.dimension_semantics<parallel>], iteration_bounds = array<i64: 1>, scalar_prefetch = 0 : i64, scratch_operands = 0 : i64, tpu.core_type = #tpu.core_type<tc>, window_params = [{transform_indices = @transform_0, window_bounds = array<i64: 8, 10>}, {pipeline_mode = #tpu.pipeline_mode<synchronous>, transform_indices = @transform_1, window_bounds = array<i64: 5, 10>}, {pipeline_mode = #tpu.pipeline_mode<synchronous>, transform_indices = @transform_2, window_bounds = array<i64: 5, 1>}, {pipeline_mode = #tpu.pipeline_mode<synchronous>, transform_indices = @transform_3, window_bounds = array<i64: 5, 1>}, {pipeline_mode = #tpu.pipeline_mode<synchronous>, transform_indices = @transform_4, window_bounds = array<i64: 1, 1>}, {transform_indices = @transform_5, window_bounds = array<i64: 1, 8>}]} {
    %c0 = arith.constant 0 : index
    %c0_0 = arith.constant 0 : index
    %0 = vector.load %arg1[%c0, %c0_0] : memref<8x10xf32, #tpu.memory_space<vmem>>, vector<8x10xf32>
    %c0_1 = arith.constant 0 : index
    %c0_2 = arith.constant 0 : index
    %1 = vector.load %arg2[%c0_1, %c0_2] : memref<5x10xf32, #tpu.memory_space<vmem>>, vector<5x10xf32>
    %cst = arith.constant dense<0.000000e+00> : vector<5x8xf32>
    %2 = tpu.matmul %1, %0, %cst {dimension_numbers = #tpu.dot_dimension_numbers<[1], [1], [0], [0], [0, 0, 1, 0], [], []>} : vector<5x10xf32>, vector<8x10xf32>, vector<5x8xf32> -> vector<5x8xf32>
    %c0_3 = arith.constant 0 : index
    %c0_4 = arith.constant 0 : index
    %3 = vector.load %arg3[%c0_3, %c0_4] : memref<5x1xf32, #tpu.memory_space<vmem>>, vector<5x1xf32>
    %4 = vector.broadcast %3 : vector<5x1xf32> to vector<5x8xf32>
    %5 = arith.addf %2, %4 : vector<5x8xf32>
    %cst_5 = arith.constant 0.000000e+00 : f32
    %6 = vector.broadcast %cst_5 : f32 to vector<5x8xf32>
    %7 = arith.maximumf %5, %6 : vector<5x8xf32>
    %c0_6 = arith.constant 0 : index
    %c0_7 = arith.constant 0 : index
    %8 = vector.load %arg4[%c0_6, %c0_7] : memref<5x1xf32, #tpu.memory_space<vmem>>, vector<5x1xf32>
    %9 = vector.broadcast %8 : vector<5x1xf32> to vector<5x8xf32>
    %10 = arith.mulf %7, %9 : vector<5x8xf32>
    %cst_8 = arith.constant dense<0.000000e+00> : vector<8xf32>
    %11 = vector.multi_reduction <add>, %10, %cst_8 [0] : vector<5x8xf32> to vector<8xf32>
    %12 = vector.shape_cast %11 : vector<8xf32> to vector<1x8xf32>
    %c0_9 = arith.constant 0 : index
    %c0_10 = arith.constant 0 : index
    %13 = vector.load %arg5[%c0_9, %c0_10] : memref<1x1xf32, #tpu.memory_space<vmem>>, vector<1x1xf32>
    %14 = vector.broadcast %13 : vector<1x1xf32> to vector<1x8xf32>
    %15 = arith.addf %12, %14 : vector<1x8xf32>
    %c0_11 = arith.constant 0 : index
    %c0_12 = arith.constant 0 : index
    %16 = vector.load %arg6[%c0_11, %c0_12] : memref<1x8xf32, #tpu.memory_space<vmem>>, vector<1x8xf32>
    tpu.vector_store %arg6[%c0_11, %c0_12], %15 {strides = array<i32>} : memref<1x8xf32, #tpu.memory_space<vmem>>, vector<1x8xf32>,
    return
  }
  func.func @transform_0(%arg0: i32) -> (i32, i32) {
    %c0_i32 = arith.constant 0 : i32
    %c0_i32_0 = arith.constant 0 : i32
    return %arg0, %c0_i32 : i32, i32
  }
  func.func @transform_1(%arg0: i32) -> (i32, i32) {
    %c0_i32 = arith.constant 0 : i32
    %c0_i32_0 = arith.constant 0 : i32
    %c0_i32_1 = arith.constant 0 : i32
    return %c0_i32, %c0_i32_0 : i32, i32
  }
  func.func @transform_2(%arg0: i32) -> (i32, i32) {
    %c0_i32 = arith.constant 0 : i32
    %c0_i32_0 = arith.constant 0 : i32
    %c0_i32_1 = arith.constant 0 : i32
    return %c0_i32, %c0_i32_0 : i32, i32
  }
  func.func @transform_3(%arg0: i32) -> (i32, i32) {
    %c0_i32 = arith.constant 0 : i32
    %c0_i32_0 = arith.constant 0 : i32
    %c0_i32_1 = arith.constant 0 : i32
    return %c0_i32, %c0_i32_0 : i32, i32
  }
  func.func @transform_4(%arg0: i32) -> (i32, i32) {
    %c0_i32 = arith.constant 0 : i32
    %c0_i32_0 = arith.constant 0 : i32
    %c0_i32_1 = arith.constant 0 : i32
    return %c0_i32, %c0_i32_0 : i32, i32
  }
  func.func @transform_5(%arg0: i32) -> (i32, i32) {
    %c0_i32 = arith.constant 0 : i32
    %c0_i32_0 = arith.constant 0 : i32
    return %c0_i32, %arg0 : i32, i32
  }
}

</mosaic_0001>

<bundles_post_ra>
// kernel: tpu_custom_call.1
= control target key start
LH: loop header
LB: loop body
LE: loop exit
PB: predicated region body
PF: predicated region fallthrough
CT: control target
= control target key end

     0   :  { %s182_s0 = inlined_call_operand.vmem [shape: f32[8,10], index: 0, kind: input, shape index: {}]   ;;  %s183_s1 = inlined_call_operand.vmem [shape: f32[5,10], index: 1, kind: input, shape index: {}]   ;;  %s184_s2 = inlined_call_operand.vmem [shape: f32[5,1], index: 2, kind: input, shape index: {}]   ;;  %s185_s3 = inlined_call_operand.vmem [shape: f32[5,1], index: 3, kind: input, shape index: {}]   ;;  %s186_s4 = inlined_call_operand.<no memory space> [shape: f32[1,1], index: 4, kind: input, shape index: {}]   ;;  %s187_s5 = inlined_call_operand.hbm [shape: f32[1,8], index: 5, kind: output, shape index: {}]  }
   0x1   :  { %v10_v0 = vstv %s186_s4 }
   0x2   :  { %11 = vst [vmem:[#allocation2] sm:$0x1] %v10_v0 }
   0x3   :  { %v23_v1 = vld [vmem:[%s182_s0] sm:$0xff]  ;;  %vm31_vm0 = vcmask 80896   ;;  %v132_v3 = vmov 0  }
   0x4   :  { %v25_v2 = vld [vmem:[%s184_s2] sm:$0x1f]  ;;  %100 = vmatpush.xpose.msk.msra.mxu0 %vm31_vm0, %v23_v1  ;;  %104 = vset.pattern.permute.xlu0 %v132_v3 }
   0x5   :  { %v24_v4 = vld [vmem:[%s183_s1] sm:$0x1f]  ;;  %28 = vperm.xlu0 %104, %v25_v2   ;;  %105 = vset.pattern.permute.xlu1 %v132_v3 }
   0x9   :  { %v74_v5 = vld [vmem:[#allocation2] sm:$0x1] }
   0xa   :  { %12 = vsyncpa [#allocation4], 0  ;;  %77 = vperm.xlu1 %105, %v74_v5   ;;  %101 = vmatmul.msk.f32.vlgmr.msra.gmra.mxu0 %vm31_vm0, %v24_v4  ;;  %v59_v6 = vld [vmem:[%s185_s3] sm:$0x1f]  ;;  %vm66_vm1 = vcmask 61440   ;;  %s133_s1 = smov [#allocation3]  }
   0xb   :  { %s89_s2 = sshll.u32 %s133_s1, 4  ;;  %s91_s27 = sshll.u32 %s187_s5, 4  ;;  %vm82_vm2 = vcmask 57344   ;;  %s90_s2 = int_to_ptr.vmem [resolvable:$true] %s89_s2  ;;  %s92_s27 = int_to_ptr.hbm [resolvable:$true] %s91_s27 }
   0xd   :  { %62 = vperm.xlu0 %104, %v59_v6  }
  0x77   :  { %v29_v7 = vpop.permute.xlu0 %28 }
  0x7c   :  { %v78_v17 = vpop.permute.xlu1 %77 }
  0x7d   :  { %v80_v20 = vperm.slane %v78_v17, 0 }
  0x7f   :  { %v63_v11 = vpop.permute.xlu0 %62 }
  0x87   :  { %v55_v8 = vpop.f32.mrf.mxu0 }
  0x88   :  { %v56_v9 = vadd.f32 %v55_v8, %v29_v7 }
  0x8a   :  { %v58_v10 = vmax.f32 %v56_v9, 0.0 }
  0x8c   :  { %v65_v12 = vmul.f32 %v63_v11, %v58_v10 }
  0x8e   :  { %v67_v13 = vsel %vm66_vm1, %v65_v12, 0.0 }
  0x8f   :  { %v68_v14 = vrot.slane %v67_v13, 4 }
  0x91   :  { %v69_v15 = vadd.f32 %v68_v14, %v67_v13 }
  0x93   :  { %v70_v16 = vrot.slane %v69_v15, 2 }
  0x95   :  { %v71_v18 = vadd.f32 %v70_v16, %v69_v15 }
  0x97   :  { %v72_v19 = vrot.slane %v71_v18, 1 }
  0x99   :  { %v73_v21 = vadd.f32 %v72_v19, %v71_v18 }
  0x9b   :  { %v81_v22 = vadd.f32 %v80_v20, %v73_v21 }
  0x9d   :  { %83 = vst.msk [vmem:[#allocation3] sm:$0x1] %vm82_vm2, %v81_v22 }
  0x9e   :  { %94 = dma.vmem_to_hbm [thread:$0]  %s90_s2, 16, %s92_s27, [#allocation4]  }
  0x9f   :  { %130 = dma.done.wait [#allocation4], 16  }
  0xa0   :  { %131 = vsyncadd [#allocation4], 4294967280 }
  0xa1   :  { %99 = vsyncpa [#allocation4], 1 }

</bundles_post_ra>
